<compile_context>
chip_gen: v6e
topology: v6e:2x2x1
jax: 0.10.0
libtpu: 0.0.40
codegen_flags: <defaults>
</compile_context>

<pallas_src>
import math

import jax
import jax.numpy as jnp
from jax.experimental import pallas as pl
from jax.experimental.pallas import tpu as pltpu

LANE = 128                      # TPU lane width; weight slabs are padded to this.
_MAX_TILE_ROWS = 2048           # batch-tile cap (sweepable; VMEM-safe everywhere).
_VMEM_LIMIT = 32 * 1024 * 1024  # raise v5e's 16 MiB scoped default; no-op on v6e/v7x.


def _round_up(x, m):
    return ((x + m - 1) // m) * m


def _choose_tile(batch):
    """Pick the batch tile (multiple of 8) and the padded batch size.

    * tiles as large as possible (up to _MAX_TILE_ROWS) to amortise per-grid
      step overhead and fill the DMA pipeline / MXU;
    * always >= 2 tiles when the padded batch is >= 16 rows so the "parallel"
      grid axis spans both TensorCores on v7x.
    """
    batch_p = max(8, _round_up(batch, 8))
    if batch_p < 16:
        tb = batch_p
    else:
        tb = min(_MAX_TILE_ROWS, _round_up(pl.cdiv(batch_p, 2), 8))
    batch_p = _round_up(batch_p, tb)
    return tb, batch_p


def _pad_batch_rows(x, batch_p):
    """Zero-pad only the batch dimension (feature dim stays at natural width)."""
    batch = x.shape[0]
    if batch_p == batch:
        return x
    return jnp.pad(x, ((0, batch_p - batch), (0, 0)))


# -----------------------------------------------------------------------------
# Kernels
# -----------------------------------------------------------------------------
def _rhs(x_f32, w_ref, b_ref, k1):
    """One ODEFunc RHS evaluation on (tb, k1) f32 activations.

    MXU operands are bf16 (weights already stored bf16), accumulation / bias
    add / ReLU stay f32.  Layer 1 contracts only the first `k1` rows of the
    padded weight slab so the activations never need lane-padding.
    Returns (tb, LANE) f32; lanes >= in_dim are exactly zero (zero weight
    columns and zero bias lanes in the packed slabs).
    """
    h = jnp.dot(x_f32.astype(jnp.bfloat16), w_ref[0, :k1, :],
                preferred_element_type=jnp.float32)
    h = jnp.maximum(h + b_ref[0], 0.0)
    h = jnp.dot(h.astype(jnp.bfloat16), w_ref[1],
                preferred_element_type=jnp.float32)
    h = jnp.maximum(h + b_ref[1], 0.0)
    o = jnp.dot(h.astype(jnp.bfloat16), w_ref[2],
                preferred_element_type=jnp.float32)
    return o + b_ref[2]


def _make_fwd_kernel(in_dim):
    """Single RHS evaluation == ODEFunc.forward(t, x); unpadded activations."""
    def kernel(x_ref, w_ref, b_ref, o_ref):
        rhs = _rhs(x_ref[...].astype(jnp.float32), w_ref, b_ref, in_dim)
        o_ref[...] = rhs[:, :in_dim].astype(o_ref.dtype)
    return kernel


def _make_euler_kernel(dt, in_dim, pad):
    """Fused forward-Euler: all solver steps in one pallas_call; f32 state in
    a VMEM scratch carried across the 'arbitrary' step axis."""
    dt = float(dt)

    def kernel(x0_ref, w_ref, b_ref, o_ref, state_ref):
        step = pl.program_id(1)

        @pl.when(step == 0)
        def _():
            # x0 is wrapper-padded to (tb, pad) with zero lanes >= in_dim;
            # those lanes stay exactly zero through the whole integration.
            state_ref[...] = x0_ref[...].astype(jnp.float32)

        x = state_ref[...]
        x_new = x + dt * _rhs(x, w_ref, b_ref, pad)   # axpy in f32
        state_ref[...] = x_new

        @pl.when(step == pl.num_programs(1) - 1)
        def _():
            o_ref[...] = x_new[:, :in_dim].astype(o_ref.dtype)

    return kernel


# -----------------------------------------------------------------------------
# Wrappers
# -----------------------------------------------------------------------------
def odefunc_forward(t, x, packed_params):
    """Pallas equivalent of ODEFunc.forward(t, x). `t` is unused, as in torch.

    Activations stay at natural feature width in HBM (no 128-lane padding, no
    XLA pad pass, no post-call lane slice); only the batch dim is padded to a
    multiple of the tile when necessary.
    """
    del t
    w_p, b_p = packed_params
    batch, in_dim = x.shape
    tb, batch_p = _choose_tile(batch)
    n_tiles = batch_p // tb
    xb = _pad_batch_rows(x, batch_p)

    out = pl.pallas_call(
        _make_fwd_kernel(in_dim),
        out_shape=jax.ShapeDtypeStruct((batch_p, in_dim), x.dtype),
        grid=(n_tiles,),
        in_specs=[
            pl.BlockSpec((tb, in_dim), lambda i: (i, 0)),
            pl.BlockSpec(w_p.shape, lambda i: (0, 0, 0)),   # resident bf16 weights
            pl.BlockSpec(b_p.shape, lambda i: (0, 0, 0)),   # resident f32 biases
        ],
        out_specs=pl.BlockSpec((tb, in_dim), lambda i: (i, 0)),
        compiler_params=pltpu.CompilerParams(
            dimension_semantics=("parallel",),
            vmem_limit_bytes=_VMEM_LIMIT),
    )(xb, w_p, b_p)
    return out[:batch] if batch_p != batch else out


def odefunc_integrate(x0, packed_params, *, num_steps, dt):
    """Forward-Euler integration of dx/dt = ODEFunc(t, x) with ALL solver steps
    fused into one pallas_call (one launch, weights DMA'd once, f32 state kept
    in a VMEM scratch)."""
    if num_steps <= 0:
        # Zero-extent step axis would leave the output block unwritten.
        return x0

    w_p, b_p = packed_params
    pad = w_p.shape[-1]
    batch, in_dim = x0.shape
    tb, batch_p = _choose_tile(batch)
    n_tiles = batch_p // tb

    # Feature-pad x0 once in the wrapper: this path is compute-bound and the
    # single pad pass is amortised over num_steps RHS evaluations.
    xp = jnp.zeros((batch_p, pad), jnp.float32).at[:batch, :in_dim].set(x0)

    out = pl.pallas_call(
        _make_euler_kernel(dt, in_dim, pad),
        out_shape=jax.ShapeDtypeStruct((batch_p, in_dim), x0.dtype),
        grid=(n_tiles, num_steps),
        in_specs=[
            pl.BlockSpec((tb, pad), lambda i, s: (i, 0)),
            pl.BlockSpec(w_p.shape, lambda i, s: (0, 0, 0)),
            pl.BlockSpec(b_p.shape, lambda i, s: (0, 0, 0)),
        ],
        out_specs=pl.BlockSpec((tb, in_dim), lambda i, s: (i, 0)),
        scratch_shapes=[pltpu.VMEM((tb, pad), jnp.float32)],
        compiler_params=pltpu.CompilerParams(
            dimension_semantics=("parallel", "arbitrary"),
            vmem_limit_bytes=_VMEM_LIMIT),
    )(xp, w_p, b_p)
    return out[:batch] if batch_p != batch else out


# -----------------------------------------------------------------------------
# Params (nn.Linear-style init) + packing
# -----------------------------------------------------------------------------
def init_odefunc_params(key, input_dim, ode_dim=20, dtype=jnp.float32):
    """nn.Linear default init (uniform +-1/sqrt(fan_in)). Weights stored as
    (in_features, out_features) so the kernel computes x @ W + b."""
    ks = jax.random.split(key, 6)

    def linear(kw, kb, fan_in, fan_out):
        bound = 1.0 / math.sqrt(fan_in)
        w = jax.random.uniform(kw, (fan_in, fan_out), dtype, -bound, bound)
        b = jax.random.uniform(kb, (1, fan_out), dtype, -bound, bound)
        return w, b

    w1, b1 = linear(ks[0], ks[1], input_dim, ode_dim)
    w2, b2 = linear(ks[2], ks[3], ode_dim, ode_dim)
    w3, b3 = linear(ks[4], ks[5], ode_dim, input_dim)
    return (w1, b1, w2, b2, w3, b3)


def pack_params(params, pad=LANE):
    """Zero-pad every layer to (pad, pad)/(1, pad) and pack into two slabs:
    weights as ONE bf16 (3, pad, pad) slab (MXU operand dtype, half the DMA
    bytes) and biases as ONE f32 (3, 1, pad) slab (bias add stays f32).
    Zero padding keeps padded lanes identically zero through the network."""
    w1, b1, w2, b2, w3, b3 = params
    in_dim, ode_dim = w1.shape
    assert in_dim <= pad and ode_dim <= pad

    w_p = jnp.zeros((3, pad, pad), jnp.float32)
    w_p = w_p.at[0, :in_dim, :ode_dim].set(w1)
    w_p = w_p.at[1, :ode_dim, :ode_dim].set(w2)
    w_p = w_p.at[2, :ode_dim, :in_dim].set(w3)
    w_p = w_p.astype(jnp.bfloat16)

    b_p = jnp.zeros((3, 1, pad), jnp.float32)
    b_p = b_p.at[0, :, :ode_dim].set(b1)
    b_p = b_p.at[1, :, :ode_dim].set(b2)
    b_p = b_p.at[2, :, :in_dim].set(b3)
    return w_p, b_p


# -----------------------------------------------------------------------------
# References for correctness checking
# -----------------------------------------------------------------------------
def odefunc_reference(t, x, params):
    """Pure-JAX f32 reference (PyTorch module math)."""
    del t
    w1, b1, w2, b2, w3, b3 = params
    h = jnp.maximum(x @ w1 + b1, 0.0)
    h = jnp.maximum(h @ w2 + b2, 0.0)
    return h @ w3 + b3


def odefunc_reference_bf16(t, x, params):
    """Same math with bf16 MXU operands / f32 accumulation — mirrors exactly
    what the kernel computes; used for the tight correctness check."""
    del t
    w1, b1, w2, b2, w3, b3 = params

    def mm(a, w):
        return jnp.dot(a.astype(jnp.bfloat16), w.astype(jnp.bfloat16),
                       preferred_element_type=jnp.float32)

    h = jnp.maximum(mm(x, w1) + b1, 0.0)
    h = jnp.maximum(mm(h, w2) + b2, 0.0)
    return mm(h, w3) + b3


if __name__ == "__main__":
    key = jax.random.PRNGKey(0)
    k_param, k_x, k_big = jax.random.split(key, 3)

    batch, input_dim, ode_dim = 8, 32, 20
    params = init_odefunc_params(k_param, input_dim, ode_dim)
    packed = pack_params(params)
    x = jax.random.normal(k_x, (batch, input_dim), dtype=jnp.float32)
    t = jnp.float32(0.0)  # unused, kept for API parity with torch forward(t, x)

    # --- single RHS evaluation (== ODEFunc.forward) -------------------------
    out = jax.block_until_ready(odefunc_forward(t, x, packed))
    assert out.shape == (batch, input_dim)
    ref_bf = odefunc_reference_bf16(t, x, params)
    ref_f32 = odefunc_reference(t, x, params)
    assert jnp.allclose(out, ref_bf, atol=2e-3, rtol=2e-3), "forward mismatch (bf16 ref)"
    assert jnp.allclose(out, ref_f32, atol=5e-2, rtol=5e-2), "forward mismatch (f32 ref)"

    # --- multi-tile / padded-batch path (>= 2 'parallel' tiles) -------------
    xb = jax.random.normal(k_big, (40, input_dim), dtype=jnp.float32)
    outb = jax.block_until_ready(odefunc_forward(t, xb, packed))
    assert outb.shape == (40, input_dim)
    assert jnp.allclose(outb, odefunc_reference_bf16(t, xb, params),
                        atol=2e-3, rtol=2e-3), "forward mismatch (multi-tile)"

    # --- fused multi-step Euler solve (one pallas_call for all steps) -------
    num_steps, dt = 16, 0.05
    xT = jax.block_until_ready(odefunc_integrate(x, packed, num_steps=num_steps, dt=dt))
    assert xT.shape == (batch, input_dim)
    xr_bf = x
    xr_f32 = x
    for _ in range(num_steps):
        xr_bf = xr_bf + dt * odefunc_reference_bf16(t, xr_bf, params)
        xr_f32 = xr_f32 + dt * odefunc_reference(t, xr_f32, params)
    assert jnp.allclose(xT, xr_bf, atol=5e-3, rtol=5e-3), "euler mismatch (bf16 ref)"
    assert jnp.allclose(xT, xr_f32, atol=1e-1, rtol=1e-1), "euler mismatch (f32 ref)"

    print("KERNEL_OK")
</pallas_src>

<mosaic_0001>
module attributes {stable_mosaic.version = 11 : i64} {
  func.func @kernel(%arg0: i32, %arg1: memref<8x32xf32, #tpu.memory_space<vmem>>, %arg2: memref<3x128x128xbf16, #tpu.memory_space<vmem>>, %arg3: memref<3x1x128xf32, #tpu.memory_space<vmem>>, %arg4: memref<8x32xf32, #tpu.memory_space<vmem>>) attributes {dimension_semantics = [#tpu.dimension_semantics<parallel>], iteration_bounds = array<i64: 1>, scalar_prefetch = 0 : i64, scratch_operands = 0 : i64, tpu.core_type = #tpu.core_type<tc>, window_params = [{transform_indices = @transform_0, window_bounds = array<i64: 8, 32>}, {pipeline_mode = #tpu.pipeline_mode<synchronous>, transform_indices = @transform_1, window_bounds = array<i64: 3, 128, 128>}, {pipeline_mode = #tpu.pipeline_mode<synchronous>, transform_indices = @transform_2, window_bounds = array<i64: 3, 1, 128>}, {transform_indices = @transform_3, window_bounds = array<i64: 8, 32>}]} {
    %c0 = arith.constant 0 : index
    %c0_0 = arith.constant 0 : index
    %0 = vector.load %arg1[%c0, %c0_0] : memref<8x32xf32, #tpu.memory_space<vmem>>, vector<8x32xf32>
    %1 = arith.truncf %0 : vector<8x32xf32> to vector<8x32xbf16>
    %c0_1 = arith.constant 0 : index
    %c0_2 = arith.constant 0 : index
    %c0_3 = arith.constant 0 : index
    %2 = vector.load %arg2[%c0_1, %c0_2, %c0_3] : memref<3x128x128xbf16, #tpu.memory_space<vmem>>, vector<1x32x128xbf16>
    %3 = vector.shape_cast %2 : vector<1x32x128xbf16> to vector<32x128xbf16>
    %cst = arith.constant dense<0.000000e+00> : vector<8x128xf32>
    %4 = tpu.matmul %1, %3, %cst {dimension_numbers = #tpu.dot_dimension_numbers<[1], [0], [0], [1], [0, 0, 1, 1], [], []>} : vector<8x32xbf16>, vector<32x128xbf16>, vector<8x128xf32> -> vector<8x128xf32>
    %c0_4 = arith.constant 0 : index
    %c0_5 = arith.constant 0 : index
    %c0_6 = arith.constant 0 : index
    %5 = vector.load %arg3[%c0_4, %c0_5, %c0_6] : memref<3x1x128xf32, #tpu.memory_space<vmem>>, vector<1x1x128xf32>
    %6 = vector.shape_cast %5 : vector<1x1x128xf32> to vector<1x128xf32>
    %7 = vector.broadcast %6 : vector<1x128xf32> to vector<8x128xf32>
    %8 = arith.addf %4, %7 : vector<8x128xf32>
    %cst_7 = arith.constant 0.000000e+00 : f32
    %9 = vector.broadcast %cst_7 : f32 to vector<8x128xf32>
    %10 = arith.maximumf %8, %9 : vector<8x128xf32>
    %11 = arith.truncf %10 : vector<8x128xf32> to vector<8x128xbf16>
    %c1 = arith.constant 1 : index
    %c0_8 = arith.constant 0 : index
    %c0_9 = arith.constant 0 : index
    %12 = vector.load %arg2[%c1, %c0_8, %c0_9] : memref<3x128x128xbf16, #tpu.memory_space<vmem>>, vector<1x128x128xbf16>
    %13 = vector.shape_cast %12 : vector<1x128x128xbf16> to vector<128x128xbf16>
    %cst_10 = arith.constant dense<0.000000e+00> : vector<8x128xf32>
    %14 = tpu.matmul %11, %13, %cst_10 {dimension_numbers = #tpu.dot_dimension_numbers<[1], [0], [0], [1], [0, 0, 1, 1], [], []>} : vector<8x128xbf16>, vector<128x128xbf16>, vector<8x128xf32> -> vector<8x128xf32>
    %c1_11 = arith.constant 1 : index
    %c0_12 = arith.constant 0 : index
    %c0_13 = arith.constant 0 : index
    %15 = vector.load %arg3[%c1_11, %c0_12, %c0_13] : memref<3x1x128xf32, #tpu.memory_space<vmem>>, vector<1x1x128xf32>
    %16 = vector.shape_cast %15 : vector<1x1x128xf32> to vector<1x128xf32>
    %17 = vector.broadcast %16 : vector<1x128xf32> to vector<8x128xf32>
    %18 = arith.addf %14, %17 : vector<8x128xf32>
    %cst_14 = arith.constant 0.000000e+00 : f32
    %19 = vector.broadcast %cst_14 : f32 to vector<8x128xf32>
    %20 = arith.maximumf %18, %19 : vector<8x128xf32>
    %21 = arith.truncf %20 : vector<8x128xf32> to vector<8x128xbf16>
    %c2 = arith.constant 2 : index
    %c0_15 = arith.constant 0 : index
    %c0_16 = arith.constant 0 : index
    %22 = vector.load %arg2[%c2, %c0_15, %c0_16] : memref<3x128x128xbf16, #tpu.memory_space<vmem>>, vector<1x128x128xbf16>
    %23 = vector.shape_cast %22 : vector<1x128x128xbf16> to vector<128x128xbf16>
    %cst_17 = arith.constant dense<0.000000e+00> : vector<8x128xf32>
    %24 = tpu.matmul %21, %23, %cst_17 {dimension_numbers = #tpu.dot_dimension_numbers<[1], [0], [0], [1], [0, 0, 1, 1], [], []>} : vector<8x128xbf16>, vector<128x128xbf16>, vector<8x128xf32> -> vector<8x128xf32>
    %c2_18 = arith.constant 2 : index
    %c0_19 = arith.constant 0 : index
    %c0_20 = arith.constant 0 : index
    %25 = vector.load %arg3[%c2_18, %c0_19, %c0_20] : memref<3x1x128xf32, #tpu.memory_space<vmem>>, vector<1x1x128xf32>
    %26 = vector.shape_cast %25 : vector<1x1x128xf32> to vector<1x128xf32>
    %27 = vector.broadcast %26 : vector<1x128xf32> to vector<8x128xf32>
    %28 = arith.addf %24, %27 : vector<8x128xf32>
    %29 = vector.extract_strided_slice %28 {offsets = [0, 0], sizes = [8, 32], strides = [1, 1]} : vector<8x128xf32> to vector<8x32xf32>
    %c0_21 = arith.constant 0 : index
    %c0_22 = arith.constant 0 : index
    %30 = vector.load %arg4[%c0_21, %c0_22] : memref<8x32xf32, #tpu.memory_space<vmem>>, vector<8x32xf32>
    tpu.vector_store %arg4[%c0_21, %c0_22], %29 {strides = array<i32>} : memref<8x32xf32, #tpu.memory_space<vmem>>, vector<8x32xf32>,
    return
  }
  func.func @transform_0(%arg0: i32) -> (i32, i32) {
    %c0_i32 = arith.constant 0 : i32
    %c0_i32_0 = arith.constant 0 : i32
    return %arg0, %c0_i32 : i32, i32
  }
  func.func @transform_1(%arg0: i32) -> (i32, i32, i32) {
    %c0_i32 = arith.constant 0 : i32
    %c0_i32_0 = arith.constant 0 : i32
    %c0_i32_1 = arith.constant 0 : i32
    %c0_i32_2 = arith.constant 0 : i32
    return %c0_i32, %c0_i32_0, %c0_i32_1 : i32, i32, i32
  }
  func.func @transform_2(%arg0: i32) -> (i32, i32, i32) {
    %c0_i32 = arith.constant 0 : i32
    %c0_i32_0 = arith.constant 0 : i32
    %c0_i32_1 = arith.constant 0 : i32
    %c0_i32_2 = arith.constant 0 : i32
    return %c0_i32, %c0_i32_0, %c0_i32_1 : i32, i32, i32
  }
  func.func @transform_3(%arg0: i32) -> (i32, i32) {
    %c0_i32 = arith.constant 0 : i32
    %c0_i32_0 = arith.constant 0 : i32
    return %arg0, %c0_i32 : i32, i32
  }
}

</mosaic_0001>

<bundles_post_ra>
// kernel: tpu_custom_call.1
= control target key start
LH: loop header
LB: loop body
LE: loop exit
PB: predicated region body
PF: predicated region fallthrough
CT: control target
= control target key end

     0   :  { %8 = vsyncpa [#allocation3], 0  ;;  %s613_s0 = inlined_call_operand.hbm [shape: f32[8,32], index: 0, kind: input, shape index: {}]   ;;  %s614_s1 = inlined_call_operand.hbm [shape: bf16[3,128,128], index: 1, kind: input, shape index: {}]   ;;  %s615_s2 = inlined_call_operand.vmem [shape: f32[3,1,128], index: 2, kind: input, shape index: {}]   ;;  %s616_s3 = inlined_call_operand.hbm [shape: f32[8,32], index: 3, kind: output, shape index: {}]  }
   0x1   :  { %9 = vsyncpa [#allocation6], 0 }
   0x2   :  { %10 = vsyncpa [#allocation4], 0  ;;  %s542_s12 = smov [#allocation2]   ;;  %s543_s14 = smov [#allocation5]  }
   0x3   :  { %s17_s13 = sshll.u32 %s542_s12, 4  ;;  %s26_s15 = sshll.u32 %s543_s14, 4  ;;  %s18_s13 = int_to_ptr.vmem [resolvable:$true] %s17_s13  ;;  %s27_s15 = int_to_ptr.vmem [resolvable:$true] %s26_s15 }
   0x4   :  { %s484_s16 = scalar_lea.vmem %s18_s13, 128  ;;  %p489_p1 = scmp.lt.s32.totalorder %s18_s13, %s18_s13 }
   0x5   :  { %p485_p0 = scmp.ne.s32.totalorder %s18_s13, %s484_s16  ;;  %p490_p2 = scmp.lt.s32.totalorder %s484_s16, %s484_s16 }
   0x7   :  { %p491_p3 = por %p490_p2, %p489_p1 }
   0x9   :  { %p492_p4 = pnand %p491_p3, %p485_p0 }
   0xb   :  { %495 = shalt.err (!%p492_p4)
}
   0xc   :  { %20 = dma.hbm_to_vmem [thread:$0]  %s613_s0, 128, %s18_s13, [#allocation3]  }
   0xd   :  { %s504_s19 = scalar_lea.vmem %s27_s15, 3072  ;;  %p509_p6 = scmp.lt.s32.totalorder %s27_s15, %s27_s15 }
   0xe   :  { %p505_p5 = scmp.ne.s32.totalorder %s27_s15, %s504_s19  ;;  %p510_p7 = scmp.lt.s32.totalorder %s504_s19, %s504_s19 }
  0x10   :  { %p511_p8 = por %p510_p7, %p509_p6 }
  0x12   :  { %p512_p9 = pnand %p511_p8, %p505_p5 }
  0x14   :  { %515 = shalt.err (!%p512_p9)
}
  0x15   :  { %s544_s20 = smov 64   ;;  %s545_s21 = smov 4  }
  0x16   :  { %32 = dma.hbm_to_vmem [thread:$0]  %s614_s1, 3072, %s27_s15, [#allocation6], %s544_s20, %s544_s20, %s545_s21  }
  0x17   :  { %536 = dma.done.wait [#allocation3], 128  }
  0x18   :  { %537 = vsyncadd [#allocation3], 4294967168 }
  0x19   :  { %538 = dma.done.wait [#allocation6], 3072  }
  0x1a   :  { %539 = vsyncadd [#allocation6], 4294964224  ;;  %v546_v0 = vmov 0.0   ;;  %vm547_vm0 = vmmov 0   ;;  %v458_v1 = vld [vmem:[#allocation5 + $0x8] sm:$0xff]   ;;  %v459_v2 = vld [vmem:[#allocation5] sm:$0xff]  }
  0x1b   :  { %403 = vmatprep.subr.bf16.mxu0 %v546_v0  ;;  %407 = vmatprep.mubr.msk.bf16.mxu0 %vm547_vm0, %v546_v0  ;;  %v42_v3 = vld [vmem:[#allocation2] sm:$0xff]  ;;  %v461_v6 = vld [vmem:[#allocation5 + $0x70] sm:$0xff]   ;;  %vm67_vm1 = vcmask 261120   ;;  %v462_v7 = vld [vmem:[#allocation5 + $0x68] sm:$0xff]   ;;  %s548_s28 = smov [#allocation7]  }
  0x1c   :  { %411 = vmatprep.subr.bf16.mxu1 %v546_v0  ;;  %427 = vmatprep.mubr.msk.bf16.mxu1 %vm547_vm0, %v546_v0  ;;  %v460_v4 = vld [vmem:[#allocation5 + $0x78] sm:$0xff]   ;;  %v43_v5 = vpack.c.bf16 %v42_v3, %v42_v3  ;;  %v463_v8 = vld [vmem:[#allocation5 + $0x60] sm:$0xff]   ;;  %v465_v10 = vld [vmem:[#allocation5 + $0x50] sm:$0xff]   ;;  %s348_s29 = sshll.u32 %s548_s28, 4  ;;  %s349_s29 = int_to_ptr.vmem [resolvable:$true] %s348_s29 }
  0x1d   :  { %404 = vmatpush3.bf16.msra.mxu0 %v458_v1  ;;  %412 = vmatpush3.bf16.msra.mxu1 %v460_v4  ;;  %v464_v9 = vld [vmem:[#allocation5 + $0x58] sm:$0xff]   ;;  %v466_v11 = vld [vmem:[#allocation5 + $0x48] sm:$0xff]   ;;  %v467_v12 = vld [vmem:[#allocation5 + $0x40] sm:$0xff]   ;;  %s516_s30 = scalar_lea.vmem %s349_s29, 128  ;;  %p521_p11 = scmp.lt.s32.totalorder %s349_s29, %s349_s29 }
  0x1e   :  { %405 = vmatprep.subr.bf16.mxu0 %v546_v0  ;;  %413 = vmatprep.subr.bf16.mxu1 %v546_v0  ;;  %v468_v13 = vld [vmem:[#allocation5 + $0xb8] sm:$0xff]   ;;  %v469_v14 = vld [vmem:[#allocation5 + $0xb0] sm:$0xff]   ;;  %v470_v15 = vld [vmem:[#allocation5 + $0xa8] sm:$0xff]   ;;  %p517_p10 = scmp.ne.s32.totalorder %s349_s29, %s516_s30  ;;  %p522_p12 = scmp.lt.s32.totalorder %s516_s30, %s516_s30 }
  0x1f   :  { %v471_v16 = vld [vmem:[#allocation5 + $0xa0] sm:$0xff]   ;;  %v472_v17 = vld [vmem:[#allocation5 + $0x98] sm:$0xff]   ;;  %v473_v18 = vld [vmem:[#allocation5 + $0x90] sm:$0xff]  }
  0x20   :  { %v358_v19 = vld [vmem:[%s615_s2] ss:$0 sm:$0xff]  ;;  %v474_v27 = vld [vmem:[#allocation5 + $0x88] sm:$0xff]   ;;  %v475_v28 = vld [vmem:[#allocation5 + $0x80] sm:$0xff]   ;;  %p523_p13 = por %p522_p12, %p521_p11 }
  0x21   :  { %406 = vmatpush3.bf16.msra.mxu0 %v459_v2  ;;  %414 = vmatpush3.bf16.msra.mxu1 %v461_v6  ;;  %v363_v29 = vld [vmem:[%s615_s2 + $0x1] ss:$0 sm:$0xff]  ;;  %v373_v37 = vld [vmem:[%s615_s2 + $0x2] ss:$0 sm:$0xff] }
  0x22   :  { %431 = vmatprep.subr.bf16.mxu0 %v546_v0  ;;  %415 = vmatprep.subr.bf16.mxu1 %v546_v0  ;;  %p524_p0 = pnand %p523_p13, %p517_p10 }
  0x24   :  { %408 = vmatmul.mubr.msk.bf16.vlgmr.msra.gmra.mxu0 %vm67_vm1, %v43_v5 }
  0x25   :  { %447 = vmatprep.mubr.msk.bf16.mxu0 %vm547_vm0, %v546_v0  ;;  %416 = vmatpush3.bf16.msra.mxu1 %v462_v7 }
  0x26   :  { %417 = vmatprep.subr.bf16.mxu1 %v546_v0  ;;  %432 = vmatpush3.bf16.msra.mxu0 %v468_v13 }
  0x27   :  { %433 = vmatprep.subr.bf16.mxu0 %v546_v0 }
  0x29   :  { %418 = vmatpush3.bf16.msra.mxu1 %v463_v8 }
  0x2a   :  { %419 = vmatprep.subr.bf16.mxu1 %v546_v0  ;;  %434 = vmatpush3.bf16.msra.mxu0 %v469_v14 }
  0x2b   :  { %435 = vmatprep.subr.bf16.mxu0 %v546_v0 }
  0x2d   :  { %420 = vmatpush3.bf16.msra.mxu1 %v464_v9 }
  0x2e   :  { %421 = vmatprep.subr.bf16.mxu1 %v546_v0  ;;  %436 = vmatpush3.bf16.msra.mxu0 %v470_v15 }
  0x2f   :  { %437 = vmatprep.subr.bf16.mxu0 %v546_v0 }
  0x31   :  { %422 = vmatpush3.bf16.msra.mxu1 %v465_v10 }
  0x32   :  { %423 = vmatprep.subr.bf16.mxu1 %v546_v0  ;;  %438 = vmatpush3.bf16.msra.mxu0 %v471_v16 }
  0x33   :  { %439 = vmatprep.subr.bf16.mxu0 %v546_v0 }
  0x35   :  { %424 = vmatpush3.bf16.msra.mxu1 %v466_v11 }
  0x36   :  { %425 = vmatprep.subr.bf16.mxu1 %v546_v0  ;;  %440 = vmatpush3.bf16.msra.mxu0 %v472_v17 }
  0x37   :  { %441 = vmatprep.subr.bf16.mxu0 %v546_v0 }
  0x39   :  { %426 = vmatpush3.bf16.msra.mxu1 %v467_v12 }
  0x3a   :  { %442 = vmatpush3.bf16.msra.mxu0 %v473_v18 }
  0x3b   :  { %443 = vmatprep.subr.bf16.mxu0 %v546_v0 }
  0x3e   :  { %444 = vmatpush3.bf16.msra.mxu0 %v474_v27 }
  0x3f   :  { %445 = vmatprep.subr.bf16.mxu0 %v546_v0 }
  0x42   :  { %446 = vmatpush3.bf16.msra.mxu0 %v475_v28 }
  0xe4   :  { %v105_v20 = vpop.f32.mrf.mxu0 }
  0xe5   :  { %v106_v21 = vadd.f32 %v358_v19, %v105_v20 }
  0xe6   :  { %v409_v22 = vpop.f32.mrf.mxu0 }
  0xe7   :  { %v111_v23 = vmax.f32 %v106_v21, 0.0 }
  0xe8   :  { %v108_v24 = vpop.f32.mrf.mxu0 }
  0xe9   :  { %v112_v25 = vpack.c.bf16 %v111_v23, %v111_v23 }
  0xea   :  { %v410_v26 = vpop.f32.mrf.mxu0 }
  0xeb   :  { %428 = vmatmul.mubr.bf16.vlgmr.msra.gmra.mxu1 %v112_v25 }
 0x1ab   :  { %v220_v30 = vpop.f32.mrf.mxu1 }
 0x1ac   :  { %v221_v31 = vadd.f32 %v363_v29, %v220_v30 }
 0x1ad   :  { %v429_v32 = vpop.f32.mrf.mxu1 }
 0x1ae   :  { %v226_v33 = vmax.f32 %v221_v31, 0.0 }
 0x1af   :  { %v223_v34 = vpop.f32.mrf.mxu1 }
 0x1b0   :  { %v227_v35 = vpack.c.bf16 %v226_v33, %v226_v33 }
 0x1b1   :  { %v430_v36 = vpop.f32.mrf.mxu1 }
 0x1b2   :  { %448 = vmatmul.mubr.bf16.vlgmr.msra.gmra.mxu0 %v227_v35 }
 0x272   :  { %v335_v38 = vpop.f32.mrf.mxu0 }
 0x273   :  { %v336_v39 = vadd.f32 %v373_v37, %v335_v38 }
 0x274   :  { %v449_v40 = vpop.f32.mrf.mxu0 }
 0x275   :  { %341 = vst.msk [vmem:[#allocation7] sm:$0xff] %vm67_vm1, %v336_v39 }
 0x276   :  { %v338_v41 = vpop.f32.mrf.mxu0 }
 0x277   :  { %527 = shalt.err (!%p524_p0)
}
 0x278   :  { %351 = dma.vmem_to_hbm [thread:$0]  %s349_s29, 128, %s616_s3, [#allocation4]   ;;  %v450_v42 = vpop.f32.mrf.mxu0 }
 0x279   :  { %540 = dma.done.wait [#allocation4], 128  }
 0x27a   :  { %541 = vsyncadd [#allocation4], 4294967168 }
 0x27b   :  { %355 = vsyncpa [#allocation3], 1 }
 0x27c   :  { %356 = vsyncpa [#allocation6], 1 }
 0x27d   :  { %357 = vsyncpa [#allocation4], 1 }

</bundles_post_ra>
